<compile_context>
chip_gen: v5e
topology: v5e:2x2
jax: 0.10.0
libtpu: 0.0.40
codegen_flags: <defaults>
</compile_context>

<pallas_src>
import jax
import jax.numpy as jnp
from jax.experimental import pallas as pl
from jax.experimental.pallas import tpu as pltpu

IN_FEATURES = 28 * 28      # 784
IN_PAD = 896               # 7 * 128 (lane-aligned K for GEMM 1)
HIDDEN = 256
OUT_FEATURES = 10
OUT_PAD = 128              # lane-aligned N for GEMM 2 / output store
MAX_TB = 512               # rows per grid step (multiple of 8; keeps tiles comfortably in VMEM)


def _round_up(x, m):
    return ((x + m - 1) // m) * m


def mlp_kernel(x_ref, w1_ref, b1_ref, w2_ref, b2_ref, o_ref):
    # x_ref : (TB, 896)  bf16      w1_ref: (896, 256) bf16   b1_ref: (1, 256) f32
    # w2_ref: (256, 128) bf16      b2_ref: (1, 128)   f32    o_ref : (TB, 128) f32
    x = x_ref[...]
    h = jnp.dot(x, w1_ref[...], preferred_element_type=jnp.float32)
    h = jnp.maximum(h + b1_ref[...], 0.0)                      # bias + ReLU in f32 (VPU)
    y = jnp.dot(h.astype(jnp.bfloat16), w2_ref[...],
                preferred_element_type=jnp.float32)
    o_ref[...] = (y + b2_ref[...]).astype(o_ref.dtype)


def mlp_forward(x, w1, b1, w2, b2, *, tb=None):
    """x: any shape whose trailing dims flatten to 784 (e.g. (B, 1, 28, 28)).
    w1: (784, 256), b1: (1, 256), w2: (256, 10), b2: (1, 10). Returns (B, 10) f32."""
    x2d = x.reshape(-1, IN_FEATURES).astype(jnp.float32)       # PyTorch's x.view(-1, 784)
    B = x2d.shape[0]

    if tb is None:
        tb = min(MAX_TB, _round_up(B, 8))                      # small B -> one small tile
    n_tiles = pl.cdiv(B, tb)
    B_pad = n_tiles * tb

    # --- lane/sublane-aligned, bf16 MXU operands (zero padding keeps the math exact) ---
    x_pad = jnp.pad(x2d, ((0, B_pad - B), (0, IN_PAD - IN_FEATURES))).astype(jnp.bfloat16)
    w1_pad = jnp.pad(w1, ((0, IN_PAD - IN_FEATURES), (0, 0))).astype(jnp.bfloat16)
    w2_pad = jnp.pad(w2, ((0, 0), (0, OUT_PAD - OUT_FEATURES))).astype(jnp.bfloat16)
    b1_f32 = b1.astype(jnp.float32)
    b2_pad = jnp.pad(b2, ((0, 0), (0, OUT_PAD - OUT_FEATURES))).astype(jnp.float32)

    resident = lambda shape: pl.BlockSpec(shape, lambda i: (0,) * len(shape))

    flops = 2 * B_pad * (IN_PAD * HIDDEN + HIDDEN * OUT_PAD)
    bytes_accessed = (x_pad.size * 2 + w1_pad.size * 2 + w2_pad.size * 2
                      + b1_f32.size * 4 + b2_pad.size * 4 + B_pad * OUT_PAD * 4)

    out_pad = pl.pallas_call(
        mlp_kernel,
        out_shape=jax.ShapeDtypeStruct((B_pad, OUT_PAD), jnp.float32),
        grid=(n_tiles,),
        in_specs=[
            pl.BlockSpec((tb, IN_PAD), lambda i: (i, 0)),      # x tile, pipelined over batch
            resident((IN_PAD, HIDDEN)),                        # w1 resident in VMEM
            resident((1, HIDDEN)),                             # b1 resident
            resident((HIDDEN, OUT_PAD)),                       # w2 resident
            resident((1, OUT_PAD)),                            # b2 resident
        ],
        out_specs=pl.BlockSpec((tb, OUT_PAD), lambda i: (i, 0)),
        compiler_params=pltpu.CompilerParams(
            dimension_semantics=("parallel",),                 # shard batch across v7x TCs
            vmem_limit_bytes=16 << 20,                         # ~4 MiB real footprint; safe on v7x
        ),
        cost_estimate=pl.CostEstimate(flops=flops, transcendentals=0,
                                      bytes_accessed=bytes_accessed),
    )(x_pad, w1_pad, b1_f32, w2_pad, b2_pad)

    return out_pad[:B, :OUT_FEATURES]


def init_params(key):
    """Deterministic init mimicking nn.Linear's uniform(-1/sqrt(fan_in), 1/sqrt(fan_in))."""
    k1, k2, k3, k4 = jax.random.split(key, 4)
    bound1 = 1.0 / jnp.sqrt(IN_FEATURES)
    bound2 = 1.0 / jnp.sqrt(HIDDEN)
    w1 = jax.random.uniform(k1, (IN_FEATURES, HIDDEN), jnp.float32, -bound1, bound1)
    b1 = jax.random.uniform(k2, (1, HIDDEN), jnp.float32, -bound1, bound1)
    w2 = jax.random.uniform(k3, (HIDDEN, OUT_FEATURES), jnp.float32, -bound2, bound2)
    b2 = jax.random.uniform(k4, (1, OUT_FEATURES), jnp.float32, -bound2, bound2)
    return w1, b1, w2, b2


if __name__ == "__main__":
    key = jax.random.PRNGKey(0)
    kx, kp = jax.random.split(key)
    # MNIST-style input: (batch=8, 1, 28, 28), NCHW (flattened inside the wrapper)
    x = jax.random.normal(kx, (8, 1, 28, 28), jnp.float32)
    w1, b1, w2, b2 = init_params(kp)

    out = mlp_forward(x, w1, b1, w2, b2)
    out = jax.block_until_ready(out)
    assert out.shape == (8, OUT_FEATURES)

    # Reference with matching bf16 operand quantization (f32 accumulation), tight tol.
    x2d = x.reshape(-1, IN_FEATURES)
    xb = x2d.astype(jnp.bfloat16).astype(jnp.float32)
    w1b = w1.astype(jnp.bfloat16).astype(jnp.float32)
    w2b = w2.astype(jnp.bfloat16).astype(jnp.float32)
    h = jnp.maximum(xb @ w1b + b1, 0.0)
    ref = h.astype(jnp.bfloat16).astype(jnp.float32) @ w2b + b2
    assert jnp.allclose(out, ref, atol=2e-3, rtol=2e-3)

    # Loose check against the pure-f32 PyTorch-equivalent forward (bf16 quantization noise).
    ref_f32 = jnp.maximum(x2d @ w1 + b1, 0.0) @ w2 + b2
    assert jnp.allclose(out, ref_f32, atol=5e-2, rtol=5e-2)

    print("KERNEL_OK")
</pallas_src>

<mosaic_0001>
module attributes {stable_mosaic.version = 11 : i64} {
  func.func @mlp_kernel(%arg0: i32, %arg1: memref<8x896xbf16, #tpu.memory_space<vmem>>, %arg2: memref<896x256xbf16, #tpu.memory_space<vmem>>, %arg3: memref<1x256xf32, #tpu.memory_space<vmem>>, %arg4: memref<256x128xbf16, #tpu.memory_space<vmem>>, %arg5: memref<1x128xf32, #tpu.memory_space<vmem>>, %arg6: memref<8x128xf32, #tpu.memory_space<vmem>>) attributes {dimension_semantics = [#tpu.dimension_semantics<parallel>], iteration_bounds = array<i64: 1>, scalar_prefetch = 0 : i64, scratch_operands = 0 : i64, tpu.core_type = #tpu.core_type<tc>, window_params = [{transform_indices = @transform_0, window_bounds = array<i64: 8, 896>}, {pipeline_mode = #tpu.pipeline_mode<synchronous>, transform_indices = @transform_1, window_bounds = array<i64: 896, 256>}, {pipeline_mode = #tpu.pipeline_mode<synchronous>, transform_indices = @transform_2, window_bounds = array<i64: 1, 256>}, {pipeline_mode = #tpu.pipeline_mode<synchronous>, transform_indices = @transform_3, window_bounds = array<i64: 256, 128>}, {pipeline_mode = #tpu.pipeline_mode<synchronous>, transform_indices = @transform_4, window_bounds = array<i64: 1, 128>}, {transform_indices = @transform_5, window_bounds = array<i64: 8, 128>}]} {
    %c0 = arith.constant 0 : index
    %c0_0 = arith.constant 0 : index
    %0 = vector.load %arg1[%c0, %c0_0] : memref<8x896xbf16, #tpu.memory_space<vmem>>, vector<8x896xbf16>
    %c0_1 = arith.constant 0 : index
    %c0_2 = arith.constant 0 : index
    %1 = vector.load %arg2[%c0_1, %c0_2] : memref<896x256xbf16, #tpu.memory_space<vmem>>, vector<896x256xbf16>
    %cst = arith.constant dense<0.000000e+00> : vector<8x256xf32>
    %2 = tpu.matmul %0, %1, %cst {dimension_numbers = #tpu.dot_dimension_numbers<[1], [0], [0], [1], [0, 0, 1, 1], [], []>} : vector<8x896xbf16>, vector<896x256xbf16>, vector<8x256xf32> -> vector<8x256xf32>
    %c0_3 = arith.constant 0 : index
    %c0_4 = arith.constant 0 : index
    %3 = vector.load %arg3[%c0_3, %c0_4] : memref<1x256xf32, #tpu.memory_space<vmem>>, vector<1x256xf32>
    %4 = vector.broadcast %3 : vector<1x256xf32> to vector<8x256xf32>
    %5 = arith.addf %2, %4 : vector<8x256xf32>
    %cst_5 = arith.constant 0.000000e+00 : f32
    %6 = vector.broadcast %cst_5 : f32 to vector<8x256xf32>
    %7 = arith.maximumf %5, %6 : vector<8x256xf32>
    %8 = arith.truncf %7 : vector<8x256xf32> to vector<8x256xbf16>
    %c0_6 = arith.constant 0 : index
    %c0_7 = arith.constant 0 : index
    %9 = vector.load %arg4[%c0_6, %c0_7] : memref<256x128xbf16, #tpu.memory_space<vmem>>, vector<256x128xbf16>
    %cst_8 = arith.constant dense<0.000000e+00> : vector<8x128xf32>
    %10 = tpu.matmul %8, %9, %cst_8 {dimension_numbers = #tpu.dot_dimension_numbers<[1], [0], [0], [1], [0, 0, 1, 1], [], []>} : vector<8x256xbf16>, vector<256x128xbf16>, vector<8x128xf32> -> vector<8x128xf32>
    %c0_9 = arith.constant 0 : index
    %c0_10 = arith.constant 0 : index
    %11 = vector.load %arg5[%c0_9, %c0_10] : memref<1x128xf32, #tpu.memory_space<vmem>>, vector<1x128xf32>
    %12 = vector.broadcast %11 : vector<1x128xf32> to vector<8x128xf32>
    %13 = arith.addf %10, %12 : vector<8x128xf32>
    %c0_11 = arith.constant 0 : index
    %c0_12 = arith.constant 0 : index
    %14 = vector.load %arg6[%c0_11, %c0_12] : memref<8x128xf32, #tpu.memory_space<vmem>>, vector<8x128xf32>
    tpu.vector_store %arg6[%c0_11, %c0_12], %13 {strides = array<i32>} : memref<8x128xf32, #tpu.memory_space<vmem>>, vector<8x128xf32>,
    return
  }
  func.func @transform_0(%arg0: i32) -> (i32, i32) {
    %c0_i32 = arith.constant 0 : i32
    %c0_i32_0 = arith.constant 0 : i32
    return %arg0, %c0_i32 : i32, i32
  }
  func.func @transform_1(%arg0: i32) -> (i32, i32) {
    %c0_i32 = arith.constant 0 : i32
    %c0_i32_0 = arith.constant 0 : i32
    %c0_i32_1 = arith.constant 0 : i32
    return %c0_i32, %c0_i32_0 : i32, i32
  }
  func.func @transform_2(%arg0: i32) -> (i32, i32) {
    %c0_i32 = arith.constant 0 : i32
    %c0_i32_0 = arith.constant 0 : i32
    %c0_i32_1 = arith.constant 0 : i32
    return %c0_i32, %c0_i32_0 : i32, i32
  }
  func.func @transform_3(%arg0: i32) -> (i32, i32) {
    %c0_i32 = arith.constant 0 : i32
    %c0_i32_0 = arith.constant 0 : i32
    %c0_i32_1 = arith.constant 0 : i32
    return %c0_i32, %c0_i32_0 : i32, i32
  }
  func.func @transform_4(%arg0: i32) -> (i32, i32) {
    %c0_i32 = arith.constant 0 : i32
    %c0_i32_0 = arith.constant 0 : i32
    %c0_i32_1 = arith.constant 0 : i32
    return %c0_i32, %c0_i32_0 : i32, i32
  }
  func.func @transform_5(%arg0: i32) -> (i32, i32) {
    %c0_i32 = arith.constant 0 : i32
    %c0_i32_0 = arith.constant 0 : i32
    return %arg0, %c0_i32 : i32, i32
  }
}

</mosaic_0001>

<bundles_post_ra>
// kernel: tpu_custom_call.1
= control target key start
LH: loop header
LB: loop body
LE: loop exit
PB: predicated region body
PF: predicated region fallthrough
CT: control target
= control target key end

     0   :  { %10 = vsyncpa [#allocation3], 0  ;;  %s2014_s0 = inlined_call_operand.hbm [shape: bf16[8,896], index: 0, kind: input, shape index: {}]   ;;  %s2015_s1 = inlined_call_operand.hbm [shape: bf16[896,256], index: 1, kind: input, shape index: {}]   ;;  %s2016_s2 = inlined_call_operand.hbm [shape: f32[1,256], index: 2, kind: input, shape index: {}]   ;;  %s2017_s3 = inlined_call_operand.hbm [shape: bf16[256,128], index: 3, kind: input, shape index: {}]   ;;  %s2018_s4 = inlined_call_operand.vmem [shape: f32[1,128], index: 4, kind: input, shape index: {}]   ;;  %s2019_s5 = inlined_call_operand.hbm [shape: f32[8,128], index: 5, kind: output, shape index: {}]  }
   0x1   :  { %11 = vsyncpa [#allocation6], 0 }
   0x2   :  { %12 = vsyncpa [#allocation9], 0  ;;  %s29_s20 = sshll.u32 %s2015_s1, 4  ;;  %s30_s20 = int_to_ptr.hbm [resolvable:$true] %s29_s20 }
   0x3   :  { %13 = vsyncpa [#allocation4], 0  ;;  %s1929_s21 = smov [#allocation5]   ;;  %s19_s25 = sshll.u32 %s2014_s0, 4  ;;  %s20_s25 = int_to_ptr.hbm [resolvable:$true] %s19_s25 }
   0x4   :  { %s31_s22 = sshll.u32 %s1929_s21, 4  ;;  %s1930_s26 = smov 128   ;;  %s32_s22 = int_to_ptr.vmem [resolvable:$true] %s31_s22 }
   0x5   :  { %s1931_s27 = smov 8   ;;  %s1932_s28 = smov [#allocation2]  }
   0x6   :  { %37 = dma.hbm_to_vmem [thread:$0]  %s30_s20, 14336, %s32_s22, [#allocation6], %s1930_s26, %s1930_s26, %s1931_s27  }
   0x7   :  { %s21_s29 = sshll.u32 %s1932_s28, 4  ;;  %s43_s7 = sshll.u32 %s2016_s2, 4  ;;  %s22_s29 = int_to_ptr.vmem [resolvable:$true] %s21_s29  ;;  %s44_s7 = int_to_ptr.hbm [resolvable:$true] %s43_s7 }
   0x8   :  { %24 = dma.hbm_to_vmem [thread:$0]  %s20_s25, 448, %s22_s29, [#allocation3]  }
   0x9   :  { %s53_s9 = sshll.u32 %s2017_s3, 4  ;;  %s1933_s10 = smov [#allocation7]   ;;  %s54_s9 = int_to_ptr.hbm [resolvable:$true] %s53_s9 }
   0xa   :  { %s45_s11 = sshll.u32 %s1933_s10, 4  ;;  %s1934_s0 = smov [#allocation8]   ;;  %s46_s11 = int_to_ptr.vmem [resolvable:$true] %s45_s11 }
   0xb   :  { %48 = dma.hbm_to_vmem [thread:$0]  %s44_s7, 32, %s46_s11, [#allocation6]  }
   0xc   :  { %s55_s12 = sshll.u32 %s1934_s0, 4  ;;  %s1935_s13 = smov 64   ;;  %s56_s12 = int_to_ptr.vmem [resolvable:$true] %s55_s12 }
   0xd   :  { %s1936_s14 = smov 4  }
   0xe   :  { %61 = dma.hbm_to_vmem [thread:$0]  %s54_s9, 2048, %s56_s12, [#allocation9], %s1935_s13, %s1935_s13, %s1936_s14  }
   0xf   :  { %1921 = dma.done.wait [#allocation3], 448  }
  0x10   :  { %1922 = vsyncadd [#allocation3], 4294966848 }
  0x11   :  { %1923 = dma.done.wait [#allocation6], 14368  }
  0x12   :  { %1924 = vsyncadd [#allocation6], 4294952928 }
  0x13   :  { %1925 = dma.done.wait [#allocation9], 2048  }
  0x14   :  { %1926 = vsyncadd [#allocation9], 4294965248  ;;  %v1209_v0 = vld [vmem:[#allocation5 + $0x70] sm:$0xf]  ;;  %v1678_v1 = vld [vmem:[#allocation5 + $0x74] sm:$0xf0] }
  0x15   :  { %v1273_v2 = vld [vmem:[#allocation5 + $0xf0] sm:$0xf]  ;;  %v1210_v3 = vor.u32 %v1678_v1, %v1209_v0  ;;  %v1694_v4 = vld [vmem:[#allocation5 + $0xf4] sm:$0xf0]  ;;  %v1201_v9 = vld [vmem:[#allocation5 + $0x60] sm:$0xf] }
  0x16   :  { %v1337_v5 = vld [vmem:[#allocation5 + $0x170] sm:$0xf]  ;;  %v1710_v6 = vld [vmem:[#allocation5 + $0x174] sm:$0xf0]  ;;  %v1274_v7 = vor.u32 %v1694_v4, %v1273_v2  ;;  %v1676_v10 = vld [vmem:[#allocation5 + $0x64] sm:$0xf0] }
  0x17   :  { %v1338_v8 = vor.u32 %v1710_v6, %v1337_v5  ;;  %v1265_v11 = vld [vmem:[#allocation5 + $0xe0] sm:$0xf]  ;;  %787 = vmatpush.bf16.msra.mxu0 %v1210_v3  ;;  %v1202_v12 = vor.u32 %v1676_v10, %v1201_v9  ;;  %v1692_v13 = vld [vmem:[#allocation5 + $0xe4] sm:$0xf0]  ;;  %v1193_v18 = vld [vmem:[#allocation5 + $0x50] sm:$0xf] }
  0x18   :  { %v1329_v14 = vld [vmem:[#allocation5 + $0x160] sm:$0xf]  ;;  %v1708_v15 = vld [vmem:[#allocation5 + $0x164] sm:$0xf0]  ;;  %800 = vmatpush.bf16.msra.mxu1 %v1274_v7  ;;  %v1266_v16 = vor.u32 %v1692_v13, %v1265_v11  ;;  %v1674_v19 = vld [vmem:[#allocation5 + $0x54] sm:$0xf0] }
  0x19   :  { %813 = vmatpush.bf16.msra.mxu2 %v1338_v8  ;;  %v1330_v17 = vor.u32 %v1708_v15, %v1329_v14  ;;  %v1257_v20 = vld [vmem:[#allocation5 + $0xd0] sm:$0xf]  ;;  %v1690_v21 = vld [vmem:[#allocation5 + $0xd4] sm:$0xf0]  ;;  %v1194_v24 = vor.u32 %v1674_v19, %v1193_v18  ;;  %v1185_v25 = vld [vmem:[#allocation5 + $0x40] sm:$0xf] }
  0x1a   :  { %v1321_v22 = vld [vmem:[#allocation5 + $0x150] sm:$0xf]  ;;  %v1706_v23 = vld [vmem:[#allocation5 + $0x154] sm:$0xf0]  ;;  %v1672_v26 = vld [vmem:[#allocation5 + $0x44] sm:$0xf0]  ;;  %v1258_v27 = vor.u32 %v1690_v21, %v1257_v20 }
  0x1b   :  { %788 = vmatpush.bf16.msra.mxu0 %v1202_v12  ;;  %v1322_v28 = vor.u32 %v1706_v23, %v1321_v22  ;;  %v1249_v29 = vld [vmem:[#allocation5 + $0xc0] sm:$0xf]  ;;  %v1401_v30 = vld [vmem:[#allocation5 + $0x1f0] sm:$0xf]  ;;  %v1726_v31 = vld [vmem:[#allocation5 + $0x1f4] sm:$0xf0]  ;;  %v1186_v37 = vor.u32 %v1672_v26, %v1185_v25 }
  0x1c   :  { %801 = vmatpush.bf16.msra.mxu1 %v1266_v16  ;;  %v1688_v32 = vld [vmem:[#allocation5 + $0xc4] sm:$0xf0]  ;;  %v1313_v33 = vld [vmem:[#allocation5 + $0x140] sm:$0xf]  ;;  %v1402_v35 = vor.u32 %v1726_v31, %v1401_v30  ;;  %v1177_v38 = vld [vmem:[#allocation5 + $0x30] sm:$0xf] }
  0x1d   :  { %814 = vmatpush.bf16.msra.mxu2 %v1330_v17  ;;  %v1704_v34 = vld [vmem:[#allocation5 + $0x144] sm:$0xf0]  ;;  %v1393_v36 = vld [vmem:[#allocation5 + $0x1e0] sm:$0xf]  ;;  %v1670_v39 = vld [vmem:[#allocation5 + $0x34] sm:$0xf0]  ;;  %v1250_v41 = vor.u32 %v1688_v32, %v1249_v29 }
  0x1e   :  { %826 = vmatpush.bf16.msra.mxu3 %v1402_v35  ;;  %v1724_v40 = vld [vmem:[#allocation5 + $0x1e4] sm:$0xf0]  ;;  %v1314_v42 = vor.u32 %v1704_v34, %v1313_v33  ;;  %v1241_v43 = vld [vmem:[#allocation5 + $0xb0] sm:$0xf]  ;;  %v1686_v44 = vld [vmem:[#allocation5 + $0xb4] sm:$0xf0]  ;;  %v1178_v50 = vor.u32 %v1670_v39, %v1177_v38 }
  0x1f   :  { %789 = vmatpush.bf16.msra.mxu0 %v1194_v24  ;;  %v1305_v45 = vld [vmem:[#allocation5 + $0x130] sm:$0xf]  ;;  %v1394_v46 = vor.u32 %v1724_v40, %v1393_v36  ;;  %v1702_v47 = vld [vmem:[#allocation5 + $0x134] sm:$0xf0]  ;;  %v1169_v51 = vld [vmem:[#allocation5 + $0x20] sm:$0xf]  ;;  %v1242_v54 = vor.u32 %v1686_v44, %v1241_v43 }
  0x20   :  { %802 = vmatpush.bf16.msra.mxu1 %v1258_v27  ;;  %v1385_v48 = vld [vmem:[#allocation5 + $0x1d0] sm:$0xf]  ;;  %v1722_v49 = vld [vmem:[#allocation5 + $0x1d4] sm:$0xf0]  ;;  %v1668_v52 = vld [vmem:[#allocation5 + $0x24] sm:$0xf0]  ;;  %v1306_v55 = vor.u32 %v1702_v47, %v1305_v45 }
  0x21   :  { %815 = vmatpush.bf16.msra.mxu2 %v1322_v28  ;;  %v1386_v53 = vor.u32 %v1722_v49, %v1385_v48  ;;  %v1233_v56 = vld [vmem:[#allocation5 + $0xa0] sm:$0xf]  ;;  %v1720_v58 = vld [vmem:[#allocation5 + $0x1c4] sm:$0xf0]  ;;  %v1170_v62 = vor.u32 %v1668_v52, %v1169_v51  ;;  %v1161_v63 = vld [vmem:[#allocation5 + $0x10] sm:$0xf] }
  0x22   :  { %827 = vmatpush.bf16.msra.mxu3 %v1394_v46  ;;  %v1377_v57 = vld [vmem:[#allocation5 + $0x1c0] sm:$0xf]  ;;  %v1684_v59 = vld [vmem:[#allocation5 + $0xa4] sm:$0xf0]  ;;  %v1666_v0 = vld [vmem:[#allocation5 + $0x14] sm:$0xf0] }
  0x23   :  { %790 = vmatpush.bf16.msra.mxu0 %v1186_v37  ;;  %v1297_v60 = vld [vmem:[#allocation5 + $0x120] sm:$0xf]  ;;  %v1700_v61 = vld [vmem:[#allocation5 + $0x124] sm:$0xf0]  ;;  %v1378_v1 = vor.u32 %v1720_v58, %v1377_v57  ;;  %v1234_v2 = vor.u32 %v1684_v59, %v1233_v56  ;;  %v1225_v4 = vld [vmem:[#allocation5 + $0x90] sm:$0xf]  ;;  %v1162_v10 = vor.u32 %v1666_v0, %v1161_v63 }
  0x24   :  { %803 = vmatpush.bf16.msra.mxu1 %v1250_v41  ;;  %v1298_v3 = vor.u32 %v1700_v61, %v1297_v60  ;;  %v1369_v5 = vld [vmem:[#allocation5 + $0x1b0] sm:$0xf]  ;;  %v1718_v6 = vld [vmem:[#allocation5 + $0x1b4] sm:$0xf0]  ;;  %v1153_v11 = vld [vmem:[#allocation5] sm:$0xf] }
  0x25   :  { %816 = vmatpush.bf16.msra.mxu2 %v1314_v42  ;;  %v1682_v7 = vld [vmem:[#allocation5 + $0x94] sm:$0xf0]  ;;  %v1289_v8 = vld [vmem:[#allocation5 + $0x110] sm:$0xf]  ;;  %v1664_v12 = vld [vmem:[#allocation5 + $0x4] sm:$0xf0]  ;;  %v1370_v14 = vor.u32 %v1718_v6, %v1369_v5 }
  0x26   :  { %828 = vmatpush.bf16.msra.mxu3 %v1386_v53  ;;  %v1698_v9 = vld [vmem:[#allocation5 + $0x114] sm:$0xf0]  ;;  %v1217_v13 = vld [vmem:[#allocation5 + $0x80] sm:$0xf]  ;;  %v1226_v15 = vor.u32 %v1682_v7, %v1225_v4  ;;  %v1680_v17 = vld [vmem:[#allocation5 + $0x84] sm:$0xf0]  ;;  %v1154_v26 = vor.u32 %v1664_v12, %v1153_v11 }
  0x27   :  { %791 = vmatpush.bf16.msra.mxu0 %v1178_v50  ;;  %v1290_v16 = vor.u32 %v1698_v9, %v1289_v8  ;;  %v1361_v18 = vld [vmem:[#allocation5 + $0x1a0] sm:$0xf]  ;;  %v1716_v19 = vld [vmem:[#allocation5 + $0x1a4] sm:$0xf0]  ;;  %v1465_v22 = vld [vmem:[#allocation5 + $0x270] sm:$0xf]  ;;  %v1218_v30 = vor.u32 %v1680_v17, %v1217_v13 }
  0x28   :  { %804 = vmatpush.bf16.msra.mxu1 %v1242_v54  ;;  %v1281_v20 = vld [vmem:[#allocation5 + $0x100] sm:$0xf]  ;;  %v1696_v21 = vld [vmem:[#allocation5 + $0x104] sm:$0xf0]  ;;  %v1742_v23 = vld [vmem:[#allocation5 + $0x274] sm:$0xf0]  ;;  %v1362_v29 = vor.u32 %v1716_v19, %v1361_v18 }
  0x29   :  { %817 = vmatpush.bf16.msra.mxu2 %v1306_v55  ;;  %v1529_v24 = vld [vmem:[#allocation5 + $0x2f0] sm:$0xf]  ;;  %v1758_v25 = vld [vmem:[#allocation5 + $0x2f4] sm:$0xf0]  ;;  %v1282_v31 = vor.u32 %v1696_v21, %v1281_v20  ;;  %v1466_v34 = vor.u32 %v1742_v23, %v1465_v22  ;;  %v1457_v36 = vld [vmem:[#allocation5 + $0x260] sm:$0xf] }
  0x2a   :  { %829 = vmatpush.bf16.msra.mxu3 %v1378_v1  ;;  %v1593_v27 = vld [vmem:[#allocation5 + $0x370] sm:$0xf]  ;;  %v1774_v28 = vld [vmem:[#allocation5 + $0x374] sm:$0xf0]  ;;  %v1530_v35 = vor.u32 %v1758_v25, %v1529_v24  ;;  %v1740_v37 = vld [vmem:[#allocation5 + $0x264] sm:$0xf0] }
  0x2b   :  { %792 = vmatpush.bf16.msra.mxu0 %v1170_v62  ;;  %v1353_v32 = vld [vmem:[#allocation5 + $0x190] sm:$0xf]  ;;  %v1714_v33 = vld [vmem:[#allocation5 + $0x194] sm:$0xf0]  ;;  %v1594_v38 = vor.u32 %v1774_v28, %v1593_v27  ;;  %v1521_v39 = vld [vmem:[#allocation5 + $0x2e0] sm:$0xf]  ;;  %v1458_v46 = vor.u32 %v1740_v37, %v1457_v36 }
  0x2c   :  { %805 = vmatpush.bf16.msra.mxu1 %v1234_v2  ;;  %v1756_v40 = vld [vmem:[#allocation5 + $0x2e4] sm:$0xf0]  ;;  %v81_v41 = vld [vmem:[#allocation2 + $0x8] sm:$0xff]  ;;  %v1585_v42 = vld [vmem:[#allocation5 + $0x360] sm:$0xf]  ;;  %v1354_v44 = vor.u32 %v1714_v33, %v1353_v32  ;;  %s1937_s15 = smov [#allocation10]  }
  0x2d   :  { %818 = vmatpush.bf16.msra.mxu2 %v1298_v3  ;;  %v1772_v43 = vld [vmem:[#allocation5 + $0x364] sm:$0xf0]  ;;  %v208_v45 = vunpack.c.l.b16 %v81_v41  ;;  %v1345_v47 = vld [vmem:[#allocation5 + $0x180] sm:$0xf]  ;;  %v1522_v50 = vor.u32 %v1756_v40, %v1521_v39  ;;  %v1449_v51 = vld [vmem:[#allocation5 + $0x250] sm:$0xf]  ;;  %v209_v61 = vunpack.c.h.b16 %v81_v41 }
  0x2e   :  { %830 = vmatpush.bf16.msra.mxu3 %v1370_v14  ;;  %v1712_v48 = vld [vmem:[#allocation5 + $0x184] sm:$0xf0]  ;;  %v1677_v52 = vld [vmem:[#allocation5 + $0x74] sm:$0xf]  ;;  %v1211_v53 = vld [vmem:[#allocation5 + $0x78] sm:$0xf0]  ;;  %v1586_v57 = vor.u32 %v1772_v43, %v1585_v42 }
  0x2f   :  { %793 = vmatpush.bf16.msra.mxu0 %v1162_v10  ;;  %v80_v49 = vld [vmem:[#allocation2] sm:$0xff]  ;;  %v1980_v54 = vpack.c.b16 %v208_v45, %v208_v45  ;;  %v1738_v58 = vld [vmem:[#allocation5 + $0x254] sm:$0xf0]  ;;  %v1513_v59 = vld [vmem:[#allocation5 + $0x2d0] sm:$0xf]  ;;  %v1346_v0 = vor.u32 %v1712_v48, %v1345_v47  ;;  %v1214_v3 = vor.u32 %v1677_v52, %v1211_v53  ;;  %v1988_v13 = vpack.c.b16 %v209_v61, %v209_v61  ;;  %s1137_s16 = sshll.u32 %s1937_s15, 4  ;;  %s1138_s16 = int_to_ptr.vmem [resolvable:$true] %s1137_s16 }
  0x30   :  { %806 = vmatpush.bf16.msra.mxu1 %v1226_v15  ;;  %v206_v55 = vunpack.c.l.b16 %v80_v49  ;;  %v207_v56 = vunpack.c.h.b16 %v80_v49  ;;  %v1754_v60 = vld [vmem:[#allocation5 + $0x2d4] sm:$0xf0]  ;;  %v1577_v62 = vld [vmem:[#allocation5 + $0x350] sm:$0xf]  ;;  %v1450_v4 = vor.u32 %v1738_v58, %v1449_v51  ;;  %v1441_v6 = vld [vmem:[#allocation5 + $0x240] sm:$0xf] }
  0x31   :  { %819 = vmatpush.bf16.msra.mxu2 %v1290_v16  ;;  %v1770_v63 = vld [vmem:[#allocation5 + $0x354] sm:$0xf0]  ;;  %v1514_v5 = vor.u32 %v1754_v60, %v1513_v59  ;;  %v1675_v7 = vld [vmem:[#allocation5 + $0x64] sm:$0xf]  ;;  %v1203_v8 = vld [vmem:[#allocation5 + $0x68] sm:$0xf0] }
  0x32   :  { %831 = vmatpush.bf16.msra.mxu3 %v1362_v29  ;;  %v1983_v1 = vpack.c.b16 %v206_v55, %v206_v55  ;;  %v1985_v2 = vpack.c.b16 %v207_v56, %v207_v56  ;;  %v1578_v9 = vor.u32 %v1770_v63, %v1577_v62  ;;  %v1736_v10 = vld [vmem:[#allocation5 + $0x244] sm:$0xf0]  ;;  %v1505_v11 = vld [vmem:[#allocation5 + $0x2c0] sm:$0xf]  ;;  %v1206_v16 = vor.u32 %v1675_v7, %v1203_v8  ;;  %v1433_v19 = vld [vmem:[#allocation5 + $0x230] sm:$0xf] }
  0x33   :  { %794 = vmatpush.bf16.msra.mxu0 %v1154_v26  ;;  %v1752_v12 = vld [vmem:[#allocation5 + $0x2c4] sm:$0xf0]  ;;  %v1569_v14 = vld [vmem:[#allocation5 + $0x340] sm:$0xf]  ;;  %v1442_v17 = vor.u32 %v1736_v10, %v1441_v6  ;;  %v1673_v20 = vld [vmem:[#allocation5 + $0x54] sm:$0xf] }
  0x34   :  { %807 = vmatpush.bf16.msra.mxu1 %v1218_v30  ;;  %v1768_v15 = vld [vmem:[#allocation5 + $0x344] sm:$0xf0]  ;;  %v1506_v18 = vor.u32 %v1752_v12, %v1505_v11  ;;  %v1195_v21 = vld [vmem:[#allocation5 + $0x58] sm:$0xf0]  ;;  %v1734_v23 = vld [vmem:[#allocation5 + $0x234] sm:$0xf0] }
  0x35   :  { %820 = vmatpush.bf16.msra.mxu2 %v1282_v31  ;;  %v1570_v22 = vor.u32 %v1768_v15, %v1569_v14  ;;  %v1497_v24 = vld [vmem:[#allocation5 + $0x2b0] sm:$0xf]  ;;  %v1750_v25 = vld [vmem:[#allocation5 + $0x2b4] sm:$0xf0]  ;;  %v1198_v28 = vor.u32 %v1673_v20, %v1195_v21  ;;  %v1434_v29 = vor.u32 %v1734_v23, %v1433_v19  ;;  %v1425_v31 = vld [vmem:[#allocation5 + $0x220] sm:$0xf] }
  0x36   :  { %832 = vmatpush.bf16.msra.mxu3 %v1354_v44  ;;  %795 = vmatmul.bf16.vlgmr.msra.gmra.mxu0 %v1983_v1  ;;  %v1561_v26 = vld [vmem:[#allocation5 + $0x330] sm:$0xf]  ;;  %v1766_v27 = vld [vmem:[#allocation5 + $0x334] sm:$0xf0]  ;;  %v1498_v30 = vor.u32 %v1750_v25, %v1497_v24  ;;  %v1671_v32 = vld [vmem:[#allocation5 + $0x44] sm:$0xf] }
  0x37   :  { %839 = vmatpush.bf16.msrb.mxu0 %v1466_v34  ;;  %808 = vmatmul.bf16.vlgmr.msra.gmra.mxu1 %v1985_v2  ;;  %v1187_v33 = vld [vmem:[#allocation5 + $0x48] sm:$0xf0]  ;;  %v1562_v34 = vor.u32 %v1766_v27, %v1561_v26  ;;  %v1489_v36 = vld [vmem:[#allocation5 + $0x2a0] sm:$0xf]  ;;  %v1748_v37 = vld [vmem:[#allocation5 + $0x2a4] sm:$0xf0] }
  0x38   :  { %852 = vmatpush.bf16.msrb.mxu1 %v1530_v35  ;;  %821 = vmatmul.bf16.vlgmr.msra.gmra.mxu2 %v1980_v54  ;;  %v1732_v35 = vld [vmem:[#allocation5 + $0x224] sm:$0xf0]  ;;  %v1190_v40 = vor.u32 %v1671_v32, %v1187_v33  ;;  %v1490_v42 = vor.u32 %v1748_v37, %v1489_v36  ;;  %v1417_v43 = vld [vmem:[#allocation5 + $0x210] sm:$0xf]  ;;  %v1669_v44 = vld [vmem:[#allocation5 + $0x34] sm:$0xf] }
  0x39   :  { %865 = vmatpush.bf16.msrb.mxu2 %v1594_v38  ;;  %v1553_v38 = vld [vmem:[#allocation5 + $0x320] sm:$0xf]  ;;  %v1764_v39 = vld [vmem:[#allocation5 + $0x324] sm:$0xf0]  ;;  %v1426_v41 = vor.u32 %v1732_v35, %v1425_v31  ;;  %v1179_v45 = vld [vmem:[#allocation5 + $0x38] sm:$0xf0] }
  0x3a   :  { %833 = vmatpush.bf16.msra.mxu3 %v1346_v0  ;;  %v1730_v47 = vld [vmem:[#allocation5 + $0x214] sm:$0xf0]  ;;  %v1481_v48 = vld [vmem:[#allocation5 + $0x290] sm:$0xf]  ;;  %v1409_v52 = vld [vmem:[#allocation5 + $0x200] sm:$0xf] }
  0x3b   :  { %840 = vmatpush.bf16.msrb.mxu0 %v1458_v46  ;;  %v1554_v46 = vor.u32 %v1764_v39, %v1553_v38  ;;  %v1746_v49 = vld [vmem:[#allocation5 + $0x294] sm:$0xf0]  ;;  %v1728_v53 = vld [vmem:[#allocation5 + $0x204] sm:$0xf0]  ;;  %v1473_v55 = vld [vmem:[#allocation5 + $0x280] sm:$0xf]  ;;  %v1418_v58 = vor.u32 %v1730_v47, %v1417_v43 }
  0x3c   :  { %853 = vmatpush.bf16.msrb.mxu1 %v1522_v50  ;;  %v1545_v50 = vld [vmem:[#allocation5 + $0x310] sm:$0xf]  ;;  %v1762_v51 = vld [vmem:[#allocation5 + $0x314] sm:$0xf0]  ;;  %v1744_v56 = vld [vmem:[#allocation5 + $0x284] sm:$0xf0]  ;;  %v1482_v59 = vor.u32 %v1746_v49, %v1481_v48  ;;  %v1410_v15 = vor.u32 %v1728_v53, %v1409_v52 }
  0x3d   :  { %866 = vmatpush.bf16.msrb.mxu2 %v1586_v57  ;;  %834 = vmatmul.bf16.vlgmr.msra.gmra.mxu3 %v1988_v13  ;;  %v1182_v57 = vor.u32 %v1669_v44, %v1179_v45  ;;  %v82_v60 = vld [vmem:[#allocation2 + $0x10] sm:$0xff]  ;;  %v1667_v61 = vld [vmem:[#allocation5 + $0x24] sm:$0xf]  ;;  %v1171_v62 = vld [vmem:[#allocation5 + $0x28] sm:$0xf0]  ;;  %v1546_v63 = vor.u32 %v1762_v51, %v1545_v50  ;;  %s1139_s19 = sshll.u32 %s2019_s5, 4  ;;  %s1140_s19 = int_to_ptr.hbm [resolvable:$true] %s1139_s19 }
  0x3e   :  { %878 = vmatpush.bf16.msrb.mxu3 %v1214_v3  ;;  %v1537_v0 = vld [vmem:[#allocation5 + $0x300] sm:$0xf]  ;;  %v1760_v3 = vld [vmem:[#allocation5 + $0x304] sm:$0xf0]  ;;  %v1275_v6 = vld [vmem:[#allocation5 + $0xf8] sm:$0xf0]  ;;  %v1174_v10 = vor.u32 %v1667_v61, %v1171_v62  ;;  %v211_v11 = vunpack.c.h.b16 %v82_v60 }
  0x3f   :  { %841 = vmatpush.bf16.msrb.mxu0 %v1450_v4  ;;  %v83_v4 = vld [vmem:[#allocation2 + $0x18] sm:$0xf]  ;;  %v1709_v7 = vld [vmem:[#allocation5 + $0x174] sm:$0xf]  ;;  %v1691_v23 = vld [vmem:[#allocation5 + $0xe4] sm:$0xf] }
  0x40   :  { %854 = vmatpush.bf16.msrb.mxu1 %v1514_v5  ;;  %v1693_v5 = vld [vmem:[#allocation5 + $0xf4] sm:$0xf]  ;;  %v1339_v8 = vld [vmem:[#allocation5 + $0x178] sm:$0xf0]  ;;  %v1267_v24 = vld [vmem:[#allocation5 + $0xe8] sm:$0xf0] }
  0x41   :  { %867 = vmatpush.bf16.msrb.mxu2 %v1578_v9  ;;  %v210_v9 = vunpack.c.l.b16 %v82_v60  ;;  %v1725_v12 = vld [vmem:[#allocation5 + $0x1f4] sm:$0xf]  ;;  %v1403_v14 = vld [vmem:[#allocation5 + $0x1f8] sm:$0xf0]  ;;  %v1278_v19 = vor.u32 %v1693_v5, %v1275_v6  ;;  %v1707_v25 = vld [vmem:[#allocation5 + $0x164] sm:$0xf]  ;;  %v1270_v35 = vor.u32 %v1691_v23, %v1267_v24 }
  0x42   :  { %879 = vmatpush.bf16.msrb.mxu3 %v1206_v16  ;;  %v1474_v16 = vor.u32 %v1744_v56, %v1473_v55  ;;  %v1665_v20 = vld [vmem:[#allocation5 + $0x14] sm:$0xf]  ;;  %v1163_v21 = vld [vmem:[#allocation5 + $0x18] sm:$0xf0]  ;;  %v1406_v26 = vor.u32 %v1725_v12, %v1403_v14  ;;  %v1395_v31 = vld [vmem:[#allocation5 + $0x1e8] sm:$0xf0] }
  0x43   :  { %842 = vmatpush.bf16.msrb.mxu0 %v1442_v17  ;;  %v212_v17 = vunpack.c.l.b16 %v83_v4  ;;  %v1992_v27 = vpack.c.b16 %v210_v9, %v210_v9  ;;  %v1166_v33 = vor.u32 %v1665_v20, %v1163_v21  ;;  %v1259_v36 = vld [vmem:[#allocation5 + $0xd8] sm:$0xf0]  ;;  %v1663_v37 = vld [vmem:[#allocation5 + $0x4] sm:$0xf]  ;;  %v1155_v38 = vld [vmem:[#allocation5 + $0x8] sm:$0xf0] }
  0x44   :  { %855 = vmatpush.bf16.msrb.mxu1 %v1506_v18  ;;  %v1538_v18 = vor.u32 %v1760_v3, %v1537_v0  ;;  %v1323_v44 = vld [vmem:[#allocation5 + $0x158] sm:$0xf0]  ;;  %v1721_v45 = vld [vmem:[#allocation5 + $0x1d4] sm:$0xf]  ;;  %v1158_v47 = vor.u32 %v1663_v37, %v1155_v38  ;;  %v1687_v49 = vld [vmem:[#allocation5 + $0xc4] sm:$0xf] }
  0x45   :  { %868 = vmatpush.bf16.msrb.mxu2 %v1570_v22  ;;  %v1342_v22 = vor.u32 %v1709_v7, %v1339_v8  ;;  %v1996_v32 = vpack.c.b16 %v212_v17, %v212_v17  ;;  %v1251_v50 = vld [vmem:[#allocation5 + $0xc8] sm:$0xf0]  ;;  %v1703_v53 = vld [vmem:[#allocation5 + $0x144] sm:$0xf]  ;;  %v1685_v62 = vld [vmem:[#allocation5 + $0xb4] sm:$0xf] }
  0x46   :  { %880 = vmatpush.bf16.msrb.mxu3 %v1198_v28  ;;  %v1331_v28 = vld [vmem:[#allocation5 + $0x168] sm:$0xf0]  ;;  %v1739_v55 = vld [vmem:[#allocation5 + $0x264] sm:$0xf]  ;;  %v1254_v61 = vor.u32 %v1687_v49, %v1251_v50  ;;  %v1701_v4 = vld [vmem:[#allocation5 + $0x134] sm:$0xf] }
  0x47   :  { %843 = vmatpush.bf16.msrb.mxu0 %v1434_v29  ;;  %v1994_v29 = vpack.c.b16 %v211_v11, %v211_v11  ;;  %v1334_v39 = vor.u32 %v1707_v25, %v1331_v28  ;;  %v1459_v56 = vld [vmem:[#allocation5 + $0x268] sm:$0xf0]  ;;  %v1737_v5 = vld [vmem:[#allocation5 + $0x254] sm:$0xf]  ;;  %v1451_v6 = vld [vmem:[#allocation5 + $0x258] sm:$0xf0] }
  0x48   :  { %856 = vmatpush.bf16.msrb.mxu1 %v1498_v30  ;;  %v1723_v30 = vld [vmem:[#allocation5 + $0x1e4] sm:$0xf]  ;;  %v1379_v60 = vld [vmem:[#allocation5 + $0x1c8] sm:$0xf0]  ;;  %v1462_v0 = vor.u32 %v1739_v55, %v1459_v56  ;;  %v1307_v8 = vld [vmem:[#allocation5 + $0x138] sm:$0xf0] }
  0x49   :  { %869 = vmatpush.bf16.msrb.mxu2 %v1562_v34  ;;  %v1689_v34 = vld [vmem:[#allocation5 + $0xd4] sm:$0xf]  ;;  %v1398_v43 = vor.u32 %v1723_v30, %v1395_v31  ;;  %v1683_v12 = vld [vmem:[#allocation5 + $0xa4] sm:$0xf]  ;;  %v1235_v14 = vld [vmem:[#allocation5 + $0xa8] sm:$0xf0] }
  0x4a   :  { %881 = vmatpush.bf16.msrb.mxu3 %v1190_v40  ;;  %v1705_v40 = vld [vmem:[#allocation5 + $0x154] sm:$0xf]  ;;  %v1262_v48 = vor.u32 %v1689_v34, %v1259_v36  ;;  %v1699_v17 = vld [vmem:[#allocation5 + $0x124] sm:$0xf]  ;;  %v1299_v21 = vld [vmem:[#allocation5 + $0x128] sm:$0xf0]  ;;  %v1238_v24 = vor.u32 %v1683_v12, %v1235_v14 }
  0x4b   :  { %844 = vmatpush.bf16.msrb.mxu0 %v1426_v41  ;;  %v1741_v41 = vld [vmem:[#allocation5 + $0x274] sm:$0xf]  ;;  %v1326_v52 = vor.u32 %v1705_v40, %v1323_v44  ;;  %v1363_v23 = vld [vmem:[#allocation5 + $0x1a8] sm:$0xf0]  ;;  %v1227_v25 = vld [vmem:[#allocation5 + $0x98] sm:$0xf0]  ;;  %v1302_v28 = vor.u32 %v1699_v17, %v1299_v21 }
  0x4c   :  { %857 = vmatpush.bf16.msrb.mxu1 %v1490_v42  ;;  %v1467_v42 = vld [vmem:[#allocation5 + $0x278] sm:$0xf0]  ;;  %v1717_v9 = vld [vmem:[#allocation5 + $0x1b4] sm:$0xf]  ;;  %v1219_v40 = vld [vmem:[#allocation5 + $0x88] sm:$0xf0] }
  0x4d   :  { %870 = vmatpush.bf16.msrb.mxu2 %v1554_v46  ;;  %v1387_v46 = vld [vmem:[#allocation5 + $0x1d8] sm:$0xf0]  ;;  %v1470_v51 = vor.u32 %v1741_v41, %v1467_v42  ;;  %v1697_v30 = vld [vmem:[#allocation5 + $0x114] sm:$0xf]  ;;  %v1695_v41 = vld [vmem:[#allocation5 + $0x104] sm:$0xf] }
  0x4e   :  { %882 = vmatpush.bf16.msrb.mxu3 %v1182_v57  ;;  %v1390_v57 = vor.u32 %v1721_v45, %v1387_v46  ;;  %v1733_v31 = vld [vmem:[#allocation5 + $0x234] sm:$0xf]  ;;  %v1355_v37 = vld [vmem:[#allocation5 + $0x198] sm:$0xf0]  ;;  %v1283_v44 = vld [vmem:[#allocation5 + $0x108] sm:$0xf0] }
  0x4f   :  { %845 = vmatpush.bf16.msrb.mxu0 %v1418_v58  ;;  %v1315_v58 = vld [vmem:[#allocation5 + $0x148] sm:$0xf0]  ;;  %v1713_v36 = vld [vmem:[#allocation5 + $0x194] sm:$0xf]  ;;  %v1731_v45 = vld [vmem:[#allocation5 + $0x224] sm:$0xf] }
  0x50   :  { %858 = vmatpush.bf16.msrb.mxu1 %v1482_v59  ;;  %v1719_v59 = vld [vmem:[#allocation5 + $0x1c4] sm:$0xf]  ;;  %v1318_v3 = vor.u32 %v1703_v53, %v1315_v58  ;;  %v1427_v46 = vld [vmem:[#allocation5 + $0x228] sm:$0xf0]  ;;  %v1531_v49 = vld [vmem:[#allocation5 + $0x2f8] sm:$0xf0] }
  0x51   :  { %871 = vmatpush.bf16.msrb.mxu2 %v1546_v63  ;;  %v1243_v63 = vld [vmem:[#allocation5 + $0xb8] sm:$0xf0]  ;;  %v1382_v7 = vor.u32 %v1719_v59, %v1379_v60  ;;  %v1773_v50 = vld [vmem:[#allocation5 + $0x374] sm:$0xf]  ;;  %v1347_v53 = vld [vmem:[#allocation5 + $0x188] sm:$0xf0]  ;;  %v1430_v56 = vor.u32 %v1731_v45, %v1427_v46 }
  0x52   :  { %883 = vmatpush.bf16.msrb.mxu3 %v1174_v10  ;;  %v1371_v10 = vld [vmem:[#allocation5 + $0x1b8] sm:$0xf0]  ;;  %v1246_v11 = vor.u32 %v1685_v62, %v1243_v63  ;;  %v1729_v59 = vld [vmem:[#allocation5 + $0x214] sm:$0xf]  ;;  %v1755_v62 = vld [vmem:[#allocation5 + $0x2e4] sm:$0xf] }
  0x53   :  { %846 = vmatpush.bf16.msrb.mxu0 %v1410_v15  ;;  %v1454_v15 = vor.u32 %v1737_v5, %v1451_v6  ;;  %v1374_v20 = vor.u32 %v1717_v9, %v1371_v10  ;;  %v1419_v60 = vld [vmem:[#allocation5 + $0x218] sm:$0xf0]  ;;  %v1523_v63 = vld [vmem:[#allocation5 + $0x2e8] sm:$0xf0]  ;;  %v1769_v14 = vld [vmem:[#allocation5 + $0x354] sm:$0xf] }
  0x54   :  { %859 = vmatpush.bf16.msrb.mxu1 %v1474_v16  ;;  %v1310_v16 = vor.u32 %v1701_v4, %v1307_v8  ;;  %v1587_v4 = vld [vmem:[#allocation5 + $0x368] sm:$0xf0]  ;;  %v1422_v5 = vor.u32 %v1729_v59, %v1419_v60  ;;  %v1526_v6 = vor.u32 %v1755_v62, %v1523_v63  ;;  %v1782_v9 = vld [vmem:[#allocation8 + $0x38] sm:$0xff]  ;;  %v1767_v21 = vld [vmem:[#allocation5 + $0x344] sm:$0xf] }
  0x55   :  { %872 = vmatpush.bf16.msrb.mxu2 %v1538_v18  ;;  %v1735_v18 = vld [vmem:[#allocation5 + $0x244] sm:$0xf]  ;;  %v1411_v8 = vld [vmem:[#allocation5 + $0x208] sm:$0xf0]  ;;  %v1515_v12 = vld [vmem:[#allocation5 + $0x2d8] sm:$0xf0] }
  0x56   :  { %847 = vmatmul.bf16.vlgmr.msrb.gmra.mxu0 %v1992_v27  ;;  %884 = vmatpush.bf16.msrb.mxu3 %v1166_v33  ;;  %v1435_v33 = vld [vmem:[#allocation5 + $0x238] sm:$0xf0] }
  0x57   :  { %891 = vmatpush.bf16.msra.mxu0 %v1278_v19  ;;  %860 = vmatmul.bf16.vlgmr.msrb.gmra.mxu1 %v1994_v29  ;;  %v1443_v19 = vld [vmem:[#allocation5 + $0x248] sm:$0xf0]  ;;  %v1438_v42 = vor.u32 %v1733_v31, %v1435_v33  ;;  %v1763_v31 = vld [vmem:[#allocation5 + $0x324] sm:$0xf] }
  0x58   :  { %904 = vmatpush.bf16.msra.mxu1 %v1342_v22  ;;  %873 = vmatmul.bf16.vlgmr.msrb.gmra.mxu2 %v1996_v32  ;;  %v1715_v22 = vld [vmem:[#allocation5 + $0x1a4] sm:$0xf]  ;;  %v1555_v33 = vld [vmem:[#allocation5 + $0x328] sm:$0xf0] }
  0x59   :  { %917 = vmatpush.bf16.msra.mxu2 %v1406_v26  ;;  %v1446_v26 = vor.u32 %v1735_v18, %v1443_v19  ;;  %v1366_v34 = vor.u32 %v1715_v22, %v1363_v23  ;;  %v1751_v19 = vld [vmem:[#allocation5 + $0x2c4] sm:$0xf]  ;;  %v1571_v22 = vld [vmem:[#allocation5 + $0x348] sm:$0xf0] }
  0x5a   :  { %885 = vmatpush.bf16.msrb.mxu3 %v1158_v47  ;;  %v1358_v47 = vor.u32 %v1713_v36, %v1355_v37  ;;  %v1574_v23 = vor.u32 %v1767_v21, %v1571_v22  ;;  %v1745_v36 = vld [vmem:[#allocation5 + $0x294] sm:$0xf]  ;;  %v1483_v37 = vld [vmem:[#allocation5 + $0x298] sm:$0xf0] }
  0x5b   :  { %892 = vmatpush.bf16.msra.mxu0 %v1270_v35  ;;  %v1291_v35 = vld [vmem:[#allocation5 + $0x118] sm:$0xf0] }
  0x5c   :  { %905 = vmatpush.bf16.msra.mxu1 %v1334_v39  ;;  %v1679_v39 = vld [vmem:[#allocation5 + $0x84] sm:$0xf]  ;;  %v1786_v21 = vld [vmem:[#allocation8 + $0x58] sm:$0xff] }
  0x5d   :  { %918 = vmatpush.bf16.msra.mxu2 %v1398_v43  ;;  %886 = vmatmul.bf16.vlgmr.msrb.gmra.mxu3 %v1983_v1  ;;  %v1681_v1 = vld [vmem:[#allocation5 + $0x94] sm:$0xf]  ;;  %v1294_v43 = vor.u32 %v1697_v30, %v1291_v35  ;;  %v1222_v55 = vor.u32 %v1679_v39, %v1219_v40  ;;  %v1491_v30 = vld [vmem:[#allocation5 + $0x2a8] sm:$0xf0]  ;;  %v1558_v35 = vor.u32 %v1763_v31, %v1555_v33  ;;  %v1547_v39 = vld [vmem:[#allocation5 + $0x318] sm:$0xf0] }
  0x5e   :  { %930 = vmatpush.bf16.msra.mxu3 %v1470_v51  ;;  %v1230_v38 = vor.u32 %v1681_v1, %v1227_v25  ;;  %v1595_v51 = vld [vmem:[#allocation5 + $0x378] sm:$0xf0] }
  0x5f   :  { %893 = vmatpush.bf16.msra.mxu0 %v1262_v48  ;;  %v1757_v48 = vld [vmem:[#allocation5 + $0x2f4] sm:$0xf]  ;;  %v1499_v1 = vld [vmem:[#allocation5 + $0x2b8] sm:$0xf0] }
  0x60   :  { %906 = vmatpush.bf16.msra.mxu1 %v1326_v52  ;;  %v1711_v52 = vld [vmem:[#allocation5 + $0x184] sm:$0xf]  ;;  %v1534_v58 = vor.u32 %v1757_v48, %v1531_v49  ;;  %v1563_v25 = vld [vmem:[#allocation5 + $0x338] sm:$0xf0]  ;;  %v1780_v48 = vld [vmem:[#allocation8 + $0x28] sm:$0xff] }
  0x61   :  { %919 = vmatpush.bf16.msra.mxu2 %v1390_v57  ;;  %v1286_v57 = vor.u32 %v1695_v41, %v1283_v44  ;;  %v1743_v41 = vld [vmem:[#allocation5 + $0x284] sm:$0xf]  ;;  %v1539_v44 = vld [vmem:[#allocation5 + $0x308] sm:$0xf0] }
  0x62   :  { %931 = vmatpush.bf16.msra.mxu3 %v1462_v0  ;;  %v1350_v0 = vor.u32 %v1711_v52, %v1347_v53  ;;  %v1779_v49 = vld [vmem:[#allocation8 + $0x20] sm:$0xff]  ;;  %v1776_v52 = vld [vmem:[#allocation8 + $0x8] sm:$0xff] }
  0x63   :  { %894 = vmatpush.bf16.msra.mxu0 %v1254_v61  ;;  %v1598_v61 = vor.u32 %v1773_v50, %v1595_v51  ;;  %v1778_v50 = vld [vmem:[#allocation8 + $0x18] sm:$0xff]  ;;  %v1777_v51 = vld [vmem:[#allocation8 + $0x10] sm:$0xff] }
  0x64   :  { %907 = vmatpush.bf16.msra.mxu1 %v1318_v3  ;;  %v1771_v3 = vld [vmem:[#allocation5 + $0x364] sm:$0xf] }
  0x65   :  { %920 = vmatpush.bf16.msra.mxu2 %v1382_v7  ;;  %v1727_v7 = vld [vmem:[#allocation5 + $0x204] sm:$0xf]  ;;  %v1590_v10 = vor.u32 %v1771_v3, %v1587_v4 }
  0x66   :  { %932 = vmatpush.bf16.msra.mxu3 %v1454_v15  ;;  %v1579_v15 = vld [vmem:[#allocation5 + $0x358] sm:$0xf0] }
  0x67   :  { %895 = vmatpush.bf16.msra.mxu0 %v1246_v11  ;;  %v1753_v11 = vld [vmem:[#allocation5 + $0x2d4] sm:$0xf]  ;;  %v1582_v18 = vor.u32 %v1769_v14, %v1579_v15 }
  0x68   :  { %908 = vmatpush.bf16.msra.mxu1 %v1310_v16  ;;  %v1414_v16 = vor.u32 %v1727_v7, %v1411_v8  ;;  %v1518_v17 = vor.u32 %v1753_v11, %v1515_v12  ;;  %v1790_v7 = vld [vmem:[#allocation8 + $0x78] sm:$0xff]  ;;  %v1788_v11 = vld [vmem:[#allocation8 + $0x68] sm:$0xff] }
  0x69   :  { %921 = vmatpush.bf16.msra.mxu2 %v1374_v20  ;;  %v1507_v20 = vld [vmem:[#allocation5 + $0x2c8] sm:$0xf0] }
  0x6a   :  { %933 = vmatpush.bf16.msra.mxu3 %v1446_v26 }
  0x6b   :  { %896 = vmatpush.bf16.msra.mxu0 %v1238_v24  ;;  %v1749_v24 = vld [vmem:[#allocation5 + $0x2b4] sm:$0xf] }
  0x6c   :  { %909 = vmatpush.bf16.msra.mxu1 %v1302_v28  ;;  %v1502_v26 = vor.u32 %v1749_v24, %v1499_v1  ;;  %v1747_v28 = vld [vmem:[#allocation5 + $0x2a4] sm:$0xf]  ;;  %v1784_v24 = vld [vmem:[#allocation8 + $0x48] sm:$0xff] }
  0x6d   :  { %922 = vmatpush.bf16.msra.mxu2 %v1366_v34  ;;  %v1494_v34 = vor.u32 %v1747_v28, %v1491_v30 }
  0x6e   :  { %934 = vmatpush.bf16.msra.mxu3 %v1438_v42  ;;  %v1475_v42 = vld [vmem:[#allocation5 + $0x288] sm:$0xf0] }
  0x6f   :  { %897 = vmatpush.bf16.msra.mxu0 %v1230_v38  ;;  %v1761_v38 = vld [vmem:[#allocation5 + $0x314] sm:$0xf]  ;;  %v1478_v45 = vor.u32 %v1743_v41, %v1475_v42 }
  0x70   :  { %910 = vmatpush.bf16.msra.mxu1 %v1294_v43  ;;  %v1550_v40 = vor.u32 %v1761_v38, %v1547_v39  ;;  %v1759_v43 = vld [vmem:[#allocation5 + $0x304] sm:$0xf] }
  0x71   :  { %923 = vmatpush.bf16.msra.mxu2 %v1358_v47  ;;  %v1542_v46 = vor.u32 %v1759_v43, %v1539_v44  ;;  %v1781_v47 = vld [vmem:[#allocation8 + $0x30] sm:$0xff] }
  0x72   :  { %935 = vmatpush.bf16.msra.mxu3 %v1430_v56 }
  0x73   :  { %898 = vmatpush.bf16.msra.mxu0 %v1222_v55 }
  0x74   :  { %911 = vmatpush.bf16.msra.mxu1 %v1286_v57  ;;  %v1775_v57 = vld [vmem:[#allocation8] sm:$0xff] }
  0x75   :  { %924 = vmatpush.bf16.msra.mxu2 %v1350_v0 }
  0x76   :  { %899 = vmatmul.bf16.vlgmr.msra.gmra.mxu0 %v1985_v2  ;;  %936 = vmatpush.bf16.msra.mxu3 %v1422_v5  ;;  %v1510_v2 = vor.u32 %v1751_v19, %v1507_v20  ;;  %v1787_v19 = vld [vmem:[#allocation8 + $0x60] sm:$0xff] }
  0x77   :  { %943 = vmatpush.bf16.msrb.mxu0 %v1534_v58  ;;  %912 = vmatmul.bf16.vlgmr.msra.gmra.mxu1 %v1980_v54  ;;  %v1765_v54 = vld [vmem:[#allocation5 + $0x334] sm:$0xf]  ;;  %v196_v58 = vld [vmem:[#allocation7] sm:$0x3] }
  0x78   :  { %956 = vmatpush.bf16.msrb.mxu1 %v1598_v61  ;;  %925 = vmatmul.bf16.vlgmr.msra.gmra.mxu2 %v1988_v13  ;;  %v1566_v13 = vor.u32 %v1765_v54, %v1563_v25  ;;  %v1783_v25 = vld [vmem:[#allocation8 + $0x40] sm:$0xff] }
  0x79   :  { %1105 = vmatpush.bf16.msrb.mxu2 %v1782_v9  ;;  %v1789_v9 = vld [vmem:[#allocation8 + $0x70] sm:$0xff] }
  0x7a   :  { %937 = vmatpush.bf16.msra.mxu3 %v1414_v16 }
  0x7b   :  { %944 = vmatpush.bf16.msrb.mxu0 %v1526_v6 }
  0x7c   :  { %957 = vmatpush.bf16.msrb.mxu1 %v1590_v10 }
  0x7d   :  { %938 = vmatmul.bf16.vlgmr.msra.gmra.mxu3 %v1992_v27  ;;  %v1486_v27 = vor.u32 %v1745_v36, %v1483_v37  ;;  %1106 = vmatpush.bf16.msrb.mxu2 %v1781_v47 }
  0x7e   :  { %1118 = vmatpush.bf16.msrb.mxu3 %v1790_v7 }
  0x7f   :  { %945 = vmatpush.bf16.msrb.mxu0 %v1518_v17 }
  0x80   :  { %958 = vmatpush.bf16.msrb.mxu1 %v1582_v18 }
  0x81   :  { %1107 = vmatpush.bf16.msrb.mxu2 %v1780_v48 }
  0x82   :  { %1119 = vmatpush.bf16.msrb.mxu3 %v1789_v9 }
  0x83   :  { %946 = vmatpush.bf16.msrb.mxu0 %v1510_v2  ;;  %v1785_v2 = vld [vmem:[#allocation8 + $0x50] sm:$0xff] }
  0x84   :  { %959 = vmatpush.bf16.msrb.mxu1 %v1574_v23 }
  0x85   :  { %1108 = vmatpush.bf16.msrb.mxu2 %v1779_v49  ;;  %v1800_v49 = vld [vmem:[%s2018_s4] ss:$0 sm:$0xff] }
  0x86   :  { %1120 = vmatpush.bf16.msrb.mxu3 %v1788_v11 }
  0x87   :  { %947 = vmatpush.bf16.msrb.mxu0 %v1502_v26  ;;  %v199_v26 = vperm.slane %v196_v58, 1 }
  0x88   :  { %960 = vmatpush.bf16.msrb.mxu1 %v1566_v13 }
  0x89   :  { %1109 = vmatpush.bf16.msrb.mxu2 %v1778_v50 }
  0x8a   :  { %1121 = vmatpush.bf16.msrb.mxu3 %v1787_v19 }
  0x8b   :  { %948 = vmatpush.bf16.msrb.mxu0 %v1494_v34 }
  0x8c   :  { %961 = vmatpush.bf16.msrb.mxu1 %v1558_v35 }
  0x8d   :  { %1110 = vmatpush.bf16.msrb.mxu2 %v1777_v51 }
  0x8e   :  { %1122 = vmatpush.bf16.msrb.mxu3 %v1786_v21 }
  0x8f   :  { %949 = vmatpush.bf16.msrb.mxu0 %v1486_v27 }
  0x90   :  { %962 = vmatpush.bf16.msrb.mxu1 %v1550_v40 }
  0x91   :  { %1111 = vmatpush.bf16.msrb.mxu2 %v1776_v52 }
  0x92   :  { %1123 = vmatpush.bf16.msrb.mxu3 %v1785_v2 }
  0x93   :  { %950 = vmatpush.bf16.msrb.mxu0 %v1478_v45 }
  0x94   :  { %963 = vmatpush.bf16.msrb.mxu1 %v1542_v46 }
  0x95   :  { %1112 = vmatpush.bf16.msrb.mxu2 %v1775_v57 }
  0x96   :  { %951 = vmatmul.bf16.vlgmr.msrb.gmra.mxu0 %v1994_v29  ;;  %v198_v29 = vperm.slane %v196_v58, 0  ;;  %1124 = vmatpush.bf16.msrb.mxu3 %v1784_v24 }
  0x97   :  { %964 = vmatmul.bf16.vlgmr.msrb.gmra.mxu1 %v1996_v32 }
  0x9a   :  { %1125 = vmatpush.bf16.msrb.mxu3 %v1783_v25 }
  0xb3   :  { %v796_v53 = vpop.f32.mrf.mxu0 }
  0xb4   :  { %v809_v55 = vpop.f32.mrf.mxu1  ;;  %v797_v61 = vadd.f32 %v796_v53, %v198_v29 }
  0xb6   :  { %v810_v63 = vadd.f32 %v809_v55, %v797_v61 }
  0xbb   :  { %v822_v56 = vpop.f32.mrf.mxu2  ;;  %v798_v32 = vpop.f32.mrf.mxu0 }
  0xbc   :  { %v811_v59 = vpop.f32.mrf.mxu1  ;;  %v823_v3 = vadd.f32 %v822_v56, %v810_v63 }
  0xc0   :  { %v835_v60 = vpop.f32.mrf.mxu3 }
  0xc1   :  { %v836_v4 = vadd.f32 %v835_v60, %v823_v3 }
  0xc3   :  { %v824_v62 = vpop.f32.mrf.mxu2 }
  0xc8   :  { %v837_v0 = vpop.f32.mrf.mxu3 }
  0xd3   :  { %v848_v5 = vpop.f32.mrf.mxu0 }
  0xd4   :  { %v861_v6 = vpop.f32.mrf.mxu1  ;;  %v849_v8 = vadd.f32 %v848_v5, %v836_v4 }
  0xd6   :  { %v862_v10 = vadd.f32 %v861_v6, %v849_v8 }
  0xdb   :  { %v874_v12 = vpop.f32.mrf.mxu2  ;;  %v850_v15 = vpop.f32.mrf.mxu0 }
  0xdc   :  { %v875_v14 = vadd.f32 %v874_v12, %v862_v10  ;;  %v863_v16 = vpop.f32.mrf.mxu1 }
  0xde   :  { %v969_v17 = vmax.f32 %v875_v14, 0.0 }
  0xe0   :  { %v971_v18 = vpack.c.bf16 %v969_v17, %v969_v17  ;;  %v887_v20 = vpop.f32.mrf.mxu3 }
  0xe1   :  { %v888_v31 = vadd.f32 %v887_v20, %v199_v26 }
  0xe2   :  { %1113 = vmatmul.bf16.vlgmr.msrb.gmra.mxu2 %v971_v18 }
  0xe3   :  { %v876_v22 = vpop.f32.mrf.mxu2 }
  0xe8   :  { %v889_v23 = vpop.f32.mrf.mxu3 }
  0xf3   :  { %v900_v1 = vpop.f32.mrf.mxu0 }
  0xf4   :  { %v913_v54 = vpop.f32.mrf.mxu1  ;;  %v901_v34 = vadd.f32 %v900_v1, %v888_v31 }
  0xf6   :  { %v914_v36 = vadd.f32 %v913_v54, %v901_v34 }
  0xfb   :  { %v902_v13 = vpop.f32.mrf.mxu0  ;;  %v926_v28 = vpop.f32.mrf.mxu2 }
  0xfc   :  { %v915_v30 = vpop.f32.mrf.mxu1  ;;  %v927_v38 = vadd.f32 %v926_v28, %v914_v36 }
 0x100   :  { %v939_v33 = vpop.f32.mrf.mxu3 }
 0x101   :  { %v940_v39 = vadd.f32 %v939_v33, %v927_v38 }
 0x103   :  { %v928_v35 = vpop.f32.mrf.mxu2 }
 0x108   :  { %v941_v37 = vpop.f32.mrf.mxu3 }
 0x113   :  { %v952_v27 = vpop.f32.mrf.mxu0 }
 0x114   :  { %v953_v40 = vadd.f32 %v952_v27, %v940_v39  ;;  %v965_v41 = vpop.f32.mrf.mxu1 }
 0x116   :  { %v966_v42 = vadd.f32 %v965_v41, %v953_v40 }
 0x118   :  { %v970_v43 = vmax.f32 %v966_v42, 0.0 }
 0x11a   :  { %v972_v44 = vpack.c.bf16 %v970_v43, %v970_v43 }
 0x11b   :  { %v954_v45 = vpop.f32.mrf.mxu0 }
 0x11c   :  { %v967_v46 = vpop.f32.mrf.mxu1  ;;  %1126 = vmatmul.bf16.vlgmr.msrb.gmra.mxu3 %v972_v44 }
 0x165   :  { %v1114_v47 = vpop.f32.mrf.mxu2 }
 0x166   :  { %v1115_v50 = vadd.f32 %v1800_v49, %v1114_v47 }
 0x16d   :  { %v1116_v48 = vpop.f32.mrf.mxu2 }
 0x19f   :  { %v1127_v51 = vpop.f32.mrf.mxu3 }
 0x1a0   :  { %v1128_v52 = vadd.f32 %v1127_v51, %v1115_v50 }
 0x1a2   :  { %1131 = vst [vmem:[#allocation10] sm:$0xff] %v1128_v52 }
 0x1a3   :  { %1142 = dma.vmem_to_hbm [thread:$0]  %s1138_s16, 128, %s1140_s19, [#allocation4]  }
 0x1a7   :  { %v1129_v53 = vpop.f32.mrf.mxu3 }
 0x1a8   :  { %1927 = dma.done.wait [#allocation4], 128  }
 0x1a9   :  { %1928 = vsyncadd [#allocation4], 4294967168 }
 0x1aa   :  { %1147 = vsyncpa [#allocation3], 1 }
 0x1ab   :  { %1148 = vsyncpa [#allocation6], 1 }
 0x1ac   :  { %1149 = vsyncpa [#allocation9], 1 }
 0x1ad   :  { %1150 = vsyncpa [#allocation4], 1 }

</bundles_post_ra>
